<compile_context>
chip_gen: v5e
topology: v5e:2x2
jax: 0.10.0
libtpu: 0.0.40
codegen_flags: <defaults>
</compile_context>

<pallas_src>
import functools

import jax
import jax.numpy as jnp
import numpy as np
from jax.experimental import pallas as pl
from jax.experimental.pallas import tpu as pltpu


def _round_up(n, m):
    return ((n + m - 1) // m) * m


def _fused_heads_kernel(x_ref, w1_ref, b_ref, w2_ref, meta_ref,
                        logits_ref, stats_ref,
                        *, ni, ns, nc, l3p, ncp):
    """Fused 3-head MLP + masked cross-entropy partial stats for one batch tile.

    x_ref     : (TB, Hp)   bf16  padded CLS hidden states (this tile)
    w1_ref    : (Hp, L3p)  bf16  [w_hi | w_hs | w_hw] (pinned)
    b_ref     : (8, BW)    f32   row 0 = first-layer biases, row 1 = second
    w2_ref    : (L3p, NCp) bf16  block-diag(w_oi, w_os, w_ow) (pinned)
    meta_ref  : (TB, 128)  f32   lanes 0..2 labels, lanes 3..5 masks
    logits_ref: (TB, NCp)  f32   lane-dense combined logits (intent|sec|worth|0)
    stats_ref : (1, 8, 128)f32   row 0 lanes 0..5 = per-tile (num,den) x 3 heads
    """
    f32 = jnp.float32
    x = x_ref[...]                                            # (TB, Hp) bf16
    b1 = b_ref[0:1, 0:l3p]                                    # (1, L3p) f32
    b2 = b_ref[1:2, 0:ncp]                                    # (1, NCp) f32

    # Fused first-layer bf16 matmul (f32 accumulate), ReLU; dropout(0.0) == id.
    h = jnp.dot(x, w1_ref[...], preferred_element_type=f32) + b1
    h = jnp.maximum(h, 0.0)
    # Block-diagonal second-layer bf16 matmul -> all three heads' logits (f32).
    logits = jnp.dot(h.astype(jnp.bfloat16), w2_ref[...],
                     preferred_element_type=f32) + b2
    logits_ref[...] = logits                                  # unmasked lane-dense vst

    meta = meta_ref[...]                                      # (TB, 128) f32
    lbl_i, lbl_s, lbl_w = meta[:, 0:1], meta[:, 1:2], meta[:, 2:3]
    mk_i, mk_s, mk_w = meta[:, 3:4], meta[:, 4:5], meta[:, 5:6]

    lane = jax.lax.broadcasted_iota(jnp.int32, (1, ncp), 1)   # (1, NCp)
    lane_f = lane.astype(f32)
    neg = jnp.float32(-1e30)                                  # keep sentinel in f32

    sel_i = lane < ni
    sel_s = jnp.logical_and(lane >= ni, lane < ni + ns)
    sel_w = jnp.logical_and(lane >= ni + ns, lane < nc)

    # Per-head row maxima (padded / other-head lanes excluded).
    m_i = jnp.max(jnp.where(sel_i, logits, neg), axis=-1, keepdims=True)
    m_s = jnp.max(jnp.where(sel_s, logits, neg), axis=-1, keepdims=True)
    m_w = jnp.max(jnp.where(sel_w, logits, neg), axis=-1, keepdims=True)

    # Single shared exp pass: splat each head's max into its lane range.
    mmap = jnp.where(sel_i, m_i, jnp.where(sel_s, m_s, jnp.where(sel_w, m_w, 0.0)))
    p = jnp.where(lane < nc, jnp.exp(logits - mmap), 0.0)     # (TB, NCp)

    lse_i = m_i + jnp.log(jnp.sum(jnp.where(sel_i, p, 0.0), axis=-1, keepdims=True))
    lse_s = m_s + jnp.log(jnp.sum(jnp.where(sel_s, p, 0.0), axis=-1, keepdims=True))
    lse_w = m_w + jnp.log(jnp.sum(jnp.where(sel_w, p, 0.0), axis=-1, keepdims=True))

    # logits[label] via iota-compare against the label column (no one-hot slab).
    g_i = jnp.sum(jnp.where(lane_f == lbl_i, logits, 0.0), axis=-1, keepdims=True)
    g_s = jnp.sum(jnp.where(lane_f == lbl_s + ni, logits, 0.0), axis=-1, keepdims=True)
    g_w = jnp.sum(jnp.where(lane_f == lbl_w + (ni + ns), logits, 0.0),
                  axis=-1, keepdims=True)

    # Per-tile partial numerators / denominators (padded rows have mask 0).
    num_i = jnp.sum((lse_i - g_i) * mk_i, axis=0, keepdims=True)   # (1, 1)
    den_i = jnp.sum(mk_i, axis=0, keepdims=True)
    num_s = jnp.sum((lse_s - g_s) * mk_s, axis=0, keepdims=True)
    den_s = jnp.sum(mk_s, axis=0, keepdims=True)
    num_w = jnp.sum((lse_w - g_w) * mk_w, axis=0, keepdims=True)
    den_w = jnp.sum(mk_w, axis=0, keepdims=True)

    # Lane-dense (8,128) stats tile: row 0 lanes [0:6) = num/den per head.
    sub8 = jax.lax.broadcasted_iota(jnp.int32, (8, 128), 0)
    lane8 = jax.lax.broadcasted_iota(jnp.int32, (8, 128), 1)
    stats = jnp.zeros((8, 128), f32)
    for idx, val in enumerate((num_i, den_i, num_s, den_s, num_w, den_w)):
        stats = jnp.where(jnp.logical_and(sub8 == 0, lane8 == idx), val, stats)
    stats_ref[0] = stats


def pack_intent_classifier_params(params):
    """Pack head weights ONCE at parameter-load time (hoisted off the fwd path).

    Returns bf16 (Hp,L3p) fused W1, bf16 block-diag (L3p,NCp) W2, f32 bias slab
    and static dims. Padded rows/cols are exact zeros.
    """
    f32 = jnp.float32
    H, L = params["w_hi"].shape
    NI = params["w_oi"].shape[1]
    NS = params["w_os"].shape[1]
    NW = params["w_ow"].shape[1]
    NC = NI + NS + NW
    Hp = _round_up(H, 128)
    L3p = _round_up(3 * L, 128)
    NCp = _round_up(max(NC, 128), 128)
    BW = max(L3p, NCp)

    w1 = jnp.zeros((Hp, L3p), f32)
    w1 = w1.at[:H, 0:L].set(params["w_hi"])
    w1 = w1.at[:H, L:2 * L].set(params["w_hs"])
    w1 = w1.at[:H, 2 * L:3 * L].set(params["w_hw"])

    w2 = jnp.zeros((L3p, NCp), f32)                           # block-diagonal
    w2 = w2.at[0:L, 0:NI].set(params["w_oi"])
    w2 = w2.at[L:2 * L, NI:NI + NS].set(params["w_os"])
    w2 = w2.at[2 * L:3 * L, NI + NS:NC].set(params["w_ow"])

    b = jnp.zeros((8, BW), f32)
    b = b.at[0, 0:L].set(params["b_hi"].reshape(-1))
    b = b.at[0, L:2 * L].set(params["b_hs"].reshape(-1))
    b = b.at[0, 2 * L:3 * L].set(params["b_hw"].reshape(-1))
    b = b.at[1, 0:NI].set(params["b_oi"].reshape(-1))
    b = b.at[1, NI:NI + NS].set(params["b_os"].reshape(-1))
    b = b.at[1, NI + NS:NC].set(params["b_ow"].reshape(-1))

    return {
        "w1": w1.astype(jnp.bfloat16),
        "w2": w2.astype(jnp.bfloat16),
        "b": b,
        "dims": dict(H=H, L=L, NI=NI, NS=NS, NW=NW, NC=NC,
                     Hp=Hp, L3p=L3p, NCp=NCp, BW=BW),
    }


def intent_classifier_forward(last_hidden_state, packed,
                              intent_labels, intent_mask,
                              section_labels, section_mask,
                              worthiness_labels, worthiness_mask,
                              lambda_section=0.1, lambda_worthiness=0.05,
                              batch_tile=256):
    """Classifier heads + masked CE loss of IntentClassifier.forward (eval)."""
    d = packed["dims"]
    Hp, L3p, NCp, BW = d["Hp"], d["L3p"], d["NCp"], d["BW"]
    NI, NS, NC = d["NI"], d["NS"], d["NC"]

    cls_hidden = last_hidden_state[:, 0, :]                   # (B, H) CLS token
    B, H = cls_hidden.shape
    assert H == d["H"]

    # Batch tile: MXU-filling multiple of 128 for large B, tiny single tile else.
    if B >= batch_tile:
        TB = batch_tile
    else:
        TB = _round_up(max(B, 8), 8)
    Bp = _round_up(max(B, TB), TB)
    n_tiles = Bp // TB

    f32 = jnp.float32
    # Per-call packing is now only the batch-dependent slabs (x + labels/masks).
    x = jnp.pad(cls_hidden.astype(jnp.bfloat16), ((0, Bp - B), (0, Hp - H)))
    meta_core = jnp.stack(
        [intent_labels.reshape(-1).astype(f32),
         section_labels.reshape(-1).astype(f32),
         worthiness_labels.reshape(-1).astype(f32),
         intent_mask.reshape(-1).astype(f32),
         section_mask.reshape(-1).astype(f32),
         worthiness_mask.reshape(-1).astype(f32)], axis=1)    # (B, 6)
    meta = jnp.pad(meta_core, ((0, Bp - B), (0, 128 - 6)))    # (Bp, 128)

    kernel = functools.partial(_fused_heads_kernel,
                               ni=NI, ns=NS, nc=NC, l3p=L3p, ncp=NCp)

    logits_all, stats = pl.pallas_call(
        kernel,
        out_shape=(jax.ShapeDtypeStruct((Bp, NCp), f32),
                   jax.ShapeDtypeStruct((n_tiles, 8, 128), f32)),
        grid=(n_tiles,),
        in_specs=[
            pl.BlockSpec((TB, Hp), lambda i: (i, 0)),         # x: batch-tiled
            pl.BlockSpec((Hp, L3p), lambda i: (0, 0)),        # W1: pinned
            pl.BlockSpec((8, BW), lambda i: (0, 0)),          # bias slab: pinned
            pl.BlockSpec((L3p, NCp), lambda i: (0, 0)),       # W2: pinned
            pl.BlockSpec((TB, 128), lambda i: (i, 0)),        # labels/masks
        ],
        out_specs=(
            pl.BlockSpec((TB, NCp), lambda i: (i, 0)),        # logits
            pl.BlockSpec((1, 8, 128), lambda i: (i, 0, 0)),   # per-tile stats
        ),
        compiler_params=pltpu.CompilerParams(
            dimension_semantics=("parallel",)),               # 2 TCs on v7x
    )(x, packed["w1"], packed["b"], packed["w2"], meta)

    # Tiny final reduction in the wrapper (no cross-tile accumulator in-kernel).
    totals = jnp.sum(stats, axis=(0, 1))                      # (128,)
    loss = (totals[0] / (totals[1] + 1e-9)
            + lambda_section * totals[2] / (totals[3] + 1e-9)
            + lambda_worthiness * totals[4] / (totals[5] + 1e-9))
    logits_intent = logits_all[:B, 0:NI]
    return logits_intent, loss


def _reference(cls_hidden, params, masks, onehots,
               lambda_section=0.1, lambda_worthiness=0.05):
    def head(x, wh, bh, wo, bo):
        return jnp.maximum(x @ wh + bh, 0.0) @ wo + bo

    def masked_ce(logits, onehot, mask):
        lse = jax.scipy.special.logsumexp(logits, axis=-1)
        nll = lse - jnp.sum(onehot * logits, axis=-1)
        return jnp.sum(nll * mask[:, 0]) / (jnp.sum(mask[:, 0]) + 1e-9)

    li = head(cls_hidden, params["w_hi"], params["b_hi"], params["w_oi"], params["b_oi"])
    ls = head(cls_hidden, params["w_hs"], params["b_hs"], params["w_os"], params["b_os"])
    lw = head(cls_hidden, params["w_hw"], params["b_hw"], params["w_ow"], params["b_ow"])
    loss = (masked_ce(li, onehots[0], masks[0])
            + lambda_section * masked_ce(ls, onehots[1], masks[1])
            + lambda_worthiness * masked_ce(lw, onehots[2], masks[2]))
    return li, loss


if __name__ == "__main__":
    # Small shapes consistent with the module's forward.
    B, S, H, L = 2, 8, 32, 32          # batch, seq, hidden_size, ln_hidden_size
    NI, NS, NW = 3, 5, 2               # num_intents, num_sections, num_worthiness
    VOCAB = 64

    key = jax.random.PRNGKey(0)
    keys = jax.random.split(key, 20)

    # ---- synthetic stand-in backbone (plain JAX glue) -----------------------
    input_ids = jax.random.randint(keys[0], (B, S), 0, VOCAB)
    token_type_ids = jnp.zeros((B, S), jnp.int32)
    attention_mask = jnp.ones((B, S), jnp.float32)

    word_emb = jax.random.normal(keys[1], (VOCAB, H), jnp.float32) * 0.1
    type_emb = jax.random.normal(keys[2], (2, H), jnp.float32) * 0.1
    pos_emb = jax.random.normal(keys[3], (S, H), jnp.float32) * 0.1
    last_hidden_state = jnp.tanh(word_emb[input_ids] + type_emb[token_type_ids]
                                 + pos_emb[None, :, :]) * attention_mask[..., None]

    # ---- classifier-head parameters (deterministic, PyTorch-Linear-like) ----
    def lin(kw, kb, fan_in, fan_out):
        bound = 1.0 / np.sqrt(fan_in)
        w = jax.random.uniform(kw, (fan_in, fan_out), jnp.float32, -bound, bound)
        b = jax.random.uniform(kb, (1, fan_out), jnp.float32, -bound, bound)
        return w, b

    params = {}
    params["w_hi"], params["b_hi"] = lin(keys[4], keys[5], H, L)
    params["w_oi"], params["b_oi"] = lin(keys[6], keys[7], L, NI)
    params["w_hs"], params["b_hs"] = lin(keys[8], keys[9], H, L)
    params["w_os"], params["b_os"] = lin(keys[10], keys[11], L, NS)
    params["w_hw"], params["b_hw"] = lin(keys[12], keys[13], H, L)
    params["w_ow"], params["b_ow"] = lin(keys[14], keys[15], L, NW)

    # Packed once at parameter-load time (hoisted out of the per-forward path).
    packed = pack_intent_classifier_params(params)

    # ---- labels / masks ------------------------------------------------------
    intent_labels = jnp.array([0, 2], jnp.int32)
    section_labels = jnp.array([1, 4], jnp.int32)
    worthiness_labels = jnp.array([1, 0], jnp.int32)
    intent_mask = jnp.array([[1.0], [1.0]], jnp.float32)
    section_mask = jnp.array([[1.0], [0.0]], jnp.float32)
    worthiness_mask = jnp.array([[1.0], [1.0]], jnp.float32)

    # ---- run Pallas kernel ---------------------------------------------------
    logits_intent, loss = intent_classifier_forward(
        last_hidden_state, packed,
        intent_labels, intent_mask,
        section_labels, section_mask,
        worthiness_labels, worthiness_mask)
    logits_intent = jax.block_until_ready(logits_intent)
    loss = jax.block_until_ready(loss)

    # ---- verify against pure-JAX f32 reference -------------------------------
    cls_hidden = last_hidden_state[:, 0, :]
    intent_oh = jax.nn.one_hot(intent_labels, NI, dtype=jnp.float32)
    section_oh = jax.nn.one_hot(section_labels, NS, dtype=jnp.float32)
    worthiness_oh = jax.nn.one_hot(worthiness_labels, NW, dtype=jnp.float32)
    ref_logits, ref_loss = _reference(
        cls_hidden, params,
        (intent_mask, section_mask, worthiness_mask),
        (intent_oh, section_oh, worthiness_oh))
    # Tolerance relaxed: kernel uses bf16 weights/activations on the MXU.
    np.testing.assert_allclose(np.asarray(logits_intent), np.asarray(ref_logits),
                               rtol=5e-2, atol=5e-2)
    np.testing.assert_allclose(float(loss), float(ref_loss), rtol=5e-2, atol=5e-2)

    print("KERNEL_OK")
</pallas_src>

<mosaic_0001>
module attributes {stable_mosaic.version = 11 : i64} {
  func.func @_fused_heads_kernel(%arg0: i32, %arg1: memref<8x128xbf16, #tpu.memory_space<vmem>>, %arg2: memref<128x128xbf16, #tpu.memory_space<vmem>>, %arg3: memref<8x128xf32, #tpu.memory_space<vmem>>, %arg4: memref<128x128xbf16, #tpu.memory_space<vmem>>, %arg5: memref<8x128xf32, #tpu.memory_space<vmem>>, %arg6: memref<8x128xf32, #tpu.memory_space<vmem>>, %arg7: memref<1x8x128xf32, #tpu.memory_space<vmem>>) attributes {dimension_semantics = [#tpu.dimension_semantics<parallel>], iteration_bounds = array<i64: 1>, scalar_prefetch = 0 : i64, scratch_operands = 0 : i64, tpu.core_type = #tpu.core_type<tc>, window_params = [{transform_indices = @transform_0, window_bounds = array<i64: 8, 128>}, {pipeline_mode = #tpu.pipeline_mode<synchronous>, transform_indices = @transform_1, window_bounds = array<i64: 128, 128>}, {pipeline_mode = #tpu.pipeline_mode<synchronous>, transform_indices = @transform_2, window_bounds = array<i64: 8, 128>}, {pipeline_mode = #tpu.pipeline_mode<synchronous>, transform_indices = @transform_3, window_bounds = array<i64: 128, 128>}, {transform_indices = @transform_4, window_bounds = array<i64: 8, 128>}, {transform_indices = @transform_5, window_bounds = array<i64: 8, 128>}, {transform_indices = @transform_6, window_bounds = array<i64: 1, 8, 128>}]} {
    %c0 = arith.constant 0 : index
    %c0_0 = arith.constant 0 : index
    %0 = vector.load %arg1[%c0, %c0_0] : memref<8x128xbf16, #tpu.memory_space<vmem>>, vector<8x128xbf16>
    %c0_1 = arith.constant 0 : index
    %c0_2 = arith.constant 0 : index
    %1 = vector.load %arg3[%c0_1, %c0_2] : memref<8x128xf32, #tpu.memory_space<vmem>>, vector<1x128xf32>
    %c1 = arith.constant 1 : index
    %c0_3 = arith.constant 0 : index
    %2 = vector.load %arg3[%c1, %c0_3] : memref<8x128xf32, #tpu.memory_space<vmem>>, vector<1x128xf32>
    %c0_4 = arith.constant 0 : index
    %c0_5 = arith.constant 0 : index
    %3 = vector.load %arg2[%c0_4, %c0_5] : memref<128x128xbf16, #tpu.memory_space<vmem>>, vector<128x128xbf16>
    %cst = arith.constant dense<0.000000e+00> : vector<8x128xf32>
    %4 = tpu.matmul %0, %3, %cst {dimension_numbers = #tpu.dot_dimension_numbers<[1], [0], [0], [1], [0, 0, 1, 1], [], []>} : vector<8x128xbf16>, vector<128x128xbf16>, vector<8x128xf32> -> vector<8x128xf32>
    %5 = vector.broadcast %1 : vector<1x128xf32> to vector<8x128xf32>
    %6 = arith.addf %4, %5 : vector<8x128xf32>
    %cst_6 = arith.constant 0.000000e+00 : f32
    %7 = vector.broadcast %cst_6 : f32 to vector<8x128xf32>
    %8 = arith.maximumf %6, %7 : vector<8x128xf32>
    %9 = arith.truncf %8 : vector<8x128xf32> to vector<8x128xbf16>
    %c0_7 = arith.constant 0 : index
    %c0_8 = arith.constant 0 : index
    %10 = vector.load %arg4[%c0_7, %c0_8] : memref<128x128xbf16, #tpu.memory_space<vmem>>, vector<128x128xbf16>
    %cst_9 = arith.constant dense<0.000000e+00> : vector<8x128xf32>
    %11 = tpu.matmul %9, %10, %cst_9 {dimension_numbers = #tpu.dot_dimension_numbers<[1], [0], [0], [1], [0, 0, 1, 1], [], []>} : vector<8x128xbf16>, vector<128x128xbf16>, vector<8x128xf32> -> vector<8x128xf32>
    %12 = vector.broadcast %2 : vector<1x128xf32> to vector<8x128xf32>
    %13 = arith.addf %11, %12 : vector<8x128xf32>
    %c0_10 = arith.constant 0 : index
    %c0_11 = arith.constant 0 : index
    %14 = vector.load %arg6[%c0_10, %c0_11] : memref<8x128xf32, #tpu.memory_space<vmem>>, vector<8x128xf32>
    tpu.vector_store %arg6[%c0_10, %c0_11], %13 {strides = array<i32>} : memref<8x128xf32, #tpu.memory_space<vmem>>, vector<8x128xf32>,
    %c0_12 = arith.constant 0 : index
    %c0_13 = arith.constant 0 : index
    %15 = vector.load %arg5[%c0_12, %c0_13] : memref<8x128xf32, #tpu.memory_space<vmem>>, vector<8x128xf32>
    %16 = vector.extract_strided_slice %15 {offsets = [0, 0], sizes = [8, 1], strides = [1, 1]} : vector<8x128xf32> to vector<8x1xf32>
    %17 = vector.extract_strided_slice %15 {offsets = [0, 1], sizes = [8, 1], strides = [1, 1]} : vector<8x128xf32> to vector<8x1xf32>
    %18 = vector.extract_strided_slice %15 {offsets = [0, 2], sizes = [8, 1], strides = [1, 1]} : vector<8x128xf32> to vector<8x1xf32>
    %19 = vector.extract_strided_slice %15 {offsets = [0, 3], sizes = [8, 1], strides = [1, 1]} : vector<8x128xf32> to vector<8x1xf32>
    %20 = vector.extract_strided_slice %15 {offsets = [0, 4], sizes = [8, 1], strides = [1, 1]} : vector<8x128xf32> to vector<8x1xf32>
    %21 = vector.extract_strided_slice %15 {offsets = [0, 5], sizes = [8, 1], strides = [1, 1]} : vector<8x128xf32> to vector<8x1xf32>
    %22 = tpu.iota {dimensions = array<i32: 1>} : vector<1x128xi32>
    %23 = arith.sitofp %22 : vector<1x128xi32> to vector<1x128xf32>
    %c3_i32 = arith.constant 3 : i32
    %24 = vector.broadcast %c3_i32 : i32 to vector<1x128xi32>
    %25 = arith.cmpi slt, %22, %24 : vector<1x128xi32>
    %c3_i32_14 = arith.constant 3 : i32
    %26 = vector.broadcast %c3_i32_14 : i32 to vector<1x128xi32>
    %27 = arith.cmpi sge, %22, %26 : vector<1x128xi32>
    %c8_i32 = arith.constant 8 : i32
    %28 = vector.broadcast %c8_i32 : i32 to vector<1x128xi32>
    %29 = arith.cmpi slt, %22, %28 : vector<1x128xi32>
    %30 = arith.andi %27, %29 : vector<1x128xi1>
    %c8_i32_15 = arith.constant 8 : i32
    %31 = vector.broadcast %c8_i32_15 : i32 to vector<1x128xi32>
    %32 = arith.cmpi sge, %22, %31 : vector<1x128xi32>
    %c10_i32 = arith.constant 10 : i32
    %33 = vector.broadcast %c10_i32 : i32 to vector<1x128xi32>
    %34 = arith.cmpi slt, %22, %33 : vector<1x128xi32>
    %35 = arith.andi %32, %34 : vector<1x128xi1>
    %cst_16 = arith.constant -1.000000e+30 : f32
    %36 = vector.shape_cast %25 : vector<1x128xi1> to vector<1x128xi1>
    %37 = vector.broadcast %36 : vector<1x128xi1> to vector<8x128xi1>
    %38 = vector.broadcast %cst_16 : f32 to vector<8x128xf32>
    %39 = arith.select %37, %13, %38 : vector<8x128xi1>, vector<8x128xf32>
    %cst_17 = arith.constant dense<0xFF800000> : vector<8xf32>
    %40 = vector.multi_reduction <maximumf>, %39, %cst_17 [1] : vector<8x128xf32> to vector<8xf32>
    %41 = vector.shape_cast %40 : vector<8xf32> to vector<8x1xf32>
    %cst_18 = arith.constant -1.000000e+30 : f32
    %42 = vector.shape_cast %30 : vector<1x128xi1> to vector<1x128xi1>
    %43 = vector.broadcast %42 : vector<1x128xi1> to vector<8x128xi1>
    %44 = vector.broadcast %cst_18 : f32 to vector<8x128xf32>
    %45 = arith.select %43, %13, %44 : vector<8x128xi1>, vector<8x128xf32>
    %cst_19 = arith.constant dense<0xFF800000> : vector<8xf32>
    %46 = vector.multi_reduction <maximumf>, %45, %cst_19 [1] : vector<8x128xf32> to vector<8xf32>
    %47 = vector.shape_cast %46 : vector<8xf32> to vector<8x1xf32>
    %cst_20 = arith.constant -1.000000e+30 : f32
    %48 = vector.shape_cast %35 : vector<1x128xi1> to vector<1x128xi1>
    %49 = vector.broadcast %48 : vector<1x128xi1> to vector<8x128xi1>
    %50 = vector.broadcast %cst_20 : f32 to vector<8x128xf32>
    %51 = arith.select %49, %13, %50 : vector<8x128xi1>, vector<8x128xf32>
    %cst_21 = arith.constant dense<0xFF800000> : vector<8xf32>
    %52 = vector.multi_reduction <maximumf>, %51, %cst_21 [1] : vector<8x128xf32> to vector<8xf32>
    %53 = vector.shape_cast %52 : vector<8xf32> to vector<8x1xf32>
    %cst_22 = arith.constant 0.000000e+00 : f32
    %54 = vector.shape_cast %35 : vector<1x128xi1> to vector<1x128xi1>
    %55 = vector.broadcast %54 : vector<1x128xi1> to vector<8x128xi1>
    %56 = vector.shape_cast %53 : vector<8x1xf32> to vector<8x1xf32>
    %57 = vector.broadcast %56 : vector<8x1xf32> to vector<8x128xf32>
    %58 = vector.broadcast %cst_22 : f32 to vector<8x128xf32>
    %59 = arith.select %55, %57, %58 : vector<8x128xi1>, vector<8x128xf32>
    %60 = vector.shape_cast %30 : vector<1x128xi1> to vector<1x128xi1>
    %61 = vector.broadcast %60 : vector<1x128xi1> to vector<8x128xi1>
    %62 = vector.shape_cast %47 : vector<8x1xf32> to vector<8x1xf32>
    %63 = vector.broadcast %62 : vector<8x1xf32> to vector<8x128xf32>
    %64 = arith.select %61, %63, %59 : vector<8x128xi1>, vector<8x128xf32>
    %65 = vector.shape_cast %25 : vector<1x128xi1> to vector<1x128xi1>
    %66 = vector.broadcast %65 : vector<1x128xi1> to vector<8x128xi1>
    %67 = vector.shape_cast %41 : vector<8x1xf32> to vector<8x1xf32>
    %68 = vector.broadcast %67 : vector<8x1xf32> to vector<8x128xf32>
    %69 = arith.select %66, %68, %64 : vector<8x128xi1>, vector<8x128xf32>
    %c10_i32_23 = arith.constant 10 : i32
    %70 = vector.broadcast %c10_i32_23 : i32 to vector<1x128xi32>
    %71 = arith.cmpi slt, %22, %70 : vector<1x128xi32>
    %72 = arith.subf %13, %69 : vector<8x128xf32>
    %73 = math.exp %72 : vector<8x128xf32>
    %cst_24 = arith.constant 0.000000e+00 : f32
    %74 = vector.shape_cast %71 : vector<1x128xi1> to vector<1x128xi1>
    %75 = vector.broadcast %74 : vector<1x128xi1> to vector<8x128xi1>
    %76 = vector.broadcast %cst_24 : f32 to vector<8x128xf32>
    %77 = arith.select %75, %73, %76 : vector<8x128xi1>, vector<8x128xf32>
    %cst_25 = arith.constant 0.000000e+00 : f32
    %78 = vector.shape_cast %25 : vector<1x128xi1> to vector<1x128xi1>
    %79 = vector.broadcast %78 : vector<1x128xi1> to vector<8x128xi1>
    %80 = vector.broadcast %cst_25 : f32 to vector<8x128xf32>
    %81 = arith.select %79, %77, %80 : vector<8x128xi1>, vector<8x128xf32>
    %cst_26 = arith.constant dense<0.000000e+00> : vector<8xf32>
    %82 = vector.multi_reduction <add>, %81, %cst_26 [1] : vector<8x128xf32> to vector<8xf32>
    %83 = vector.shape_cast %82 : vector<8xf32> to vector<8x1xf32>
    %84 = math.log %83 : vector<8x1xf32>
    %85 = arith.addf %41, %84 : vector<8x1xf32>
    %cst_27 = arith.constant 0.000000e+00 : f32
    %86 = vector.shape_cast %30 : vector<1x128xi1> to vector<1x128xi1>
    %87 = vector.broadcast %86 : vector<1x128xi1> to vector<8x128xi1>
    %88 = vector.broadcast %cst_27 : f32 to vector<8x128xf32>
    %89 = arith.select %87, %77, %88 : vector<8x128xi1>, vector<8x128xf32>
    %cst_28 = arith.constant dense<0.000000e+00> : vector<8xf32>
    %90 = vector.multi_reduction <add>, %89, %cst_28 [1] : vector<8x128xf32> to vector<8xf32>
    %91 = vector.shape_cast %90 : vector<8xf32> to vector<8x1xf32>
    %92 = math.log %91 : vector<8x1xf32>
    %93 = arith.addf %47, %92 : vector<8x1xf32>
    %cst_29 = arith.constant 0.000000e+00 : f32
    %94 = vector.shape_cast %35 : vector<1x128xi1> to vector<1x128xi1>
    %95 = vector.broadcast %94 : vector<1x128xi1> to vector<8x128xi1>
    %96 = vector.broadcast %cst_29 : f32 to vector<8x128xf32>
    %97 = arith.select %95, %77, %96 : vector<8x128xi1>, vector<8x128xf32>
    %cst_30 = arith.constant dense<0.000000e+00> : vector<8xf32>
    %98 = vector.multi_reduction <add>, %97, %cst_30 [1] : vector<8x128xf32> to vector<8xf32>
    %99 = vector.shape_cast %98 : vector<8xf32> to vector<8x1xf32>
    %100 = math.log %99 : vector<8x1xf32>
    %101 = arith.addf %53, %100 : vector<8x1xf32>
    %102 = vector.broadcast %23 : vector<1x128xf32> to vector<8x128xf32>
    %103 = vector.broadcast %16 : vector<8x1xf32> to vector<8x128xf32>
    %104 = arith.cmpf oeq, %102, %103 : vector<8x128xf32>
    %cst_31 = arith.constant 0.000000e+00 : f32
    %105 = vector.broadcast %cst_31 : f32 to vector<8x128xf32>
    %106 = arith.select %104, %13, %105 : vector<8x128xi1>, vector<8x128xf32>
    %cst_32 = arith.constant dense<0.000000e+00> : vector<8xf32>
    %107 = vector.multi_reduction <add>, %106, %cst_32 [1] : vector<8x128xf32> to vector<8xf32>
    %108 = vector.shape_cast %107 : vector<8xf32> to vector<8x1xf32>
    %cst_33 = arith.constant 3.000000e+00 : f32
    %109 = vector.broadcast %cst_33 : f32 to vector<8x1xf32>
    %110 = arith.addf %17, %109 : vector<8x1xf32>
    %111 = vector.broadcast %23 : vector<1x128xf32> to vector<8x128xf32>
    %112 = vector.broadcast %110 : vector<8x1xf32> to vector<8x128xf32>
    %113 = arith.cmpf oeq, %111, %112 : vector<8x128xf32>
    %cst_34 = arith.constant 0.000000e+00 : f32
    %114 = vector.broadcast %cst_34 : f32 to vector<8x128xf32>
    %115 = arith.select %113, %13, %114 : vector<8x128xi1>, vector<8x128xf32>
    %cst_35 = arith.constant dense<0.000000e+00> : vector<8xf32>
    %116 = vector.multi_reduction <add>, %115, %cst_35 [1] : vector<8x128xf32> to vector<8xf32>
    %117 = vector.shape_cast %116 : vector<8xf32> to vector<8x1xf32>
    %cst_36 = arith.constant 8.000000e+00 : f32
    %118 = vector.broadcast %cst_36 : f32 to vector<8x1xf32>
    %119 = arith.addf %18, %118 : vector<8x1xf32>
    %120 = vector.broadcast %23 : vector<1x128xf32> to vector<8x128xf32>
    %121 = vector.broadcast %119 : vector<8x1xf32> to vector<8x128xf32>
    %122 = arith.cmpf oeq, %120, %121 : vector<8x128xf32>
    %cst_37 = arith.constant 0.000000e+00 : f32
    %123 = vector.broadcast %cst_37 : f32 to vector<8x128xf32>
    %124 = arith.select %122, %13, %123 : vector<8x128xi1>, vector<8x128xf32>
    %cst_38 = arith.constant dense<0.000000e+00> : vector<8xf32>
    %125 = vector.multi_reduction <add>, %124, %cst_38 [1] : vector<8x128xf32> to vector<8xf32>
    %126 = vector.shape_cast %125 : vector<8xf32> to vector<8x1xf32>
    %127 = arith.subf %85, %108 : vector<8x1xf32>
    %128 = arith.mulf %127, %19 : vector<8x1xf32>
    %cst_39 = arith.constant dense<0.000000e+00> : vector<1xf32>
    %129 = vector.multi_reduction <add>, %128, %cst_39 [0] : vector<8x1xf32> to vector<1xf32>
    %130 = vector.shape_cast %129 : vector<1xf32> to vector<1x1xf32>
    %cst_40 = arith.constant dense<0.000000e+00> : vector<1xf32>
    %131 = vector.multi_reduction <add>, %19, %cst_40 [0] : vector<8x1xf32> to vector<1xf32>
    %132 = vector.shape_cast %131 : vector<1xf32> to vector<1x1xf32>
    %133 = arith.subf %93, %117 : vector<8x1xf32>
    %134 = arith.mulf %133, %20 : vector<8x1xf32>
    %cst_41 = arith.constant dense<0.000000e+00> : vector<1xf32>
    %135 = vector.multi_reduction <add>, %134, %cst_41 [0] : vector<8x1xf32> to vector<1xf32>
    %136 = vector.shape_cast %135 : vector<1xf32> to vector<1x1xf32>
    %cst_42 = arith.constant dense<0.000000e+00> : vector<1xf32>
    %137 = vector.multi_reduction <add>, %20, %cst_42 [0] : vector<8x1xf32> to vector<1xf32>
    %138 = vector.shape_cast %137 : vector<1xf32> to vector<1x1xf32>
    %139 = arith.subf %101, %126 : vector<8x1xf32>
    %140 = arith.mulf %139, %21 : vector<8x1xf32>
    %cst_43 = arith.constant dense<0.000000e+00> : vector<1xf32>
    %141 = vector.multi_reduction <add>, %140, %cst_43 [0] : vector<8x1xf32> to vector<1xf32>
    %142 = vector.shape_cast %141 : vector<1xf32> to vector<1x1xf32>
    %cst_44 = arith.constant dense<0.000000e+00> : vector<1xf32>
    %143 = vector.multi_reduction <add>, %21, %cst_44 [0] : vector<8x1xf32> to vector<1xf32>
    %144 = vector.shape_cast %143 : vector<1xf32> to vector<1x1xf32>
    %145 = tpu.iota {dimensions = array<i32: 0>} : vector<8x128xi32>
    %146 = tpu.iota {dimensions = array<i32: 1>} : vector<8x128xi32>
    %cst_45 = arith.constant 0.000000e+00 : f32
    %147 = vector.broadcast %cst_45 : f32 to vector<8x128xf32>
    %c0_i32 = arith.constant 0 : i32
    %148 = vector.broadcast %c0_i32 : i32 to vector<8x128xi32>
    %149 = arith.cmpi eq, %145, %148 : vector<8x128xi32>
    %c0_i32_46 = arith.constant 0 : i32
    %150 = vector.broadcast %c0_i32_46 : i32 to vector<8x128xi32>
    %151 = arith.cmpi eq, %146, %150 : vector<8x128xi32>
    %152 = arith.andi %149, %151 : vector<8x128xi1>
    %153 = vector.shape_cast %130 : vector<1x1xf32> to vector<1x1xf32>
    %154 = vector.broadcast %153 : vector<1x1xf32> to vector<8x128xf32>
    %155 = arith.select %152, %154, %147 : vector<8x128xi1>, vector<8x128xf32>
    %c0_i32_47 = arith.constant 0 : i32
    %156 = vector.broadcast %c0_i32_47 : i32 to vector<8x128xi32>
    %157 = arith.cmpi eq, %145, %156 : vector<8x128xi32>
    %c1_i32 = arith.constant 1 : i32
    %158 = vector.broadcast %c1_i32 : i32 to vector<8x128xi32>
    %159 = arith.cmpi eq, %146, %158 : vector<8x128xi32>
    %160 = arith.andi %157, %159 : vector<8x128xi1>
    %161 = vector.shape_cast %132 : vector<1x1xf32> to vector<1x1xf32>
    %162 = vector.broadcast %161 : vector<1x1xf32> to vector<8x128xf32>
    %163 = arith.select %160, %162, %155 : vector<8x128xi1>, vector<8x128xf32>
    %c0_i32_48 = arith.constant 0 : i32
    %164 = vector.broadcast %c0_i32_48 : i32 to vector<8x128xi32>
    %165 = arith.cmpi eq, %145, %164 : vector<8x128xi32>
    %c2_i32 = arith.constant 2 : i32
    %166 = vector.broadcast %c2_i32 : i32 to vector<8x128xi32>
    %167 = arith.cmpi eq, %146, %166 : vector<8x128xi32>
    %168 = arith.andi %165, %167 : vector<8x128xi1>
    %169 = vector.shape_cast %136 : vector<1x1xf32> to vector<1x1xf32>
    %170 = vector.broadcast %169 : vector<1x1xf32> to vector<8x128xf32>
    %171 = arith.select %168, %170, %163 : vector<8x128xi1>, vector<8x128xf32>
    %c0_i32_49 = arith.constant 0 : i32
    %172 = vector.broadcast %c0_i32_49 : i32 to vector<8x128xi32>
    %173 = arith.cmpi eq, %145, %172 : vector<8x128xi32>
    %c3_i32_50 = arith.constant 3 : i32
    %174 = vector.broadcast %c3_i32_50 : i32 to vector<8x128xi32>
    %175 = arith.cmpi eq, %146, %174 : vector<8x128xi32>
    %176 = arith.andi %173, %175 : vector<8x128xi1>
    %177 = vector.shape_cast %138 : vector<1x1xf32> to vector<1x1xf32>
    %178 = vector.broadcast %177 : vector<1x1xf32> to vector<8x128xf32>
    %179 = arith.select %176, %178, %171 : vector<8x128xi1>, vector<8x128xf32>
    %c0_i32_51 = arith.constant 0 : i32
    %180 = vector.broadcast %c0_i32_51 : i32 to vector<8x128xi32>
    %181 = arith.cmpi eq, %145, %180 : vector<8x128xi32>
    %c4_i32 = arith.constant 4 : i32
    %182 = vector.broadcast %c4_i32 : i32 to vector<8x128xi32>
    %183 = arith.cmpi eq, %146, %182 : vector<8x128xi32>
    %184 = arith.andi %181, %183 : vector<8x128xi1>
    %185 = vector.shape_cast %142 : vector<1x1xf32> to vector<1x1xf32>
    %186 = vector.broadcast %185 : vector<1x1xf32> to vector<8x128xf32>
    %187 = arith.select %184, %186, %179 : vector<8x128xi1>, vector<8x128xf32>
    %c0_i32_52 = arith.constant 0 : i32
    %188 = vector.broadcast %c0_i32_52 : i32 to vector<8x128xi32>
    %189 = arith.cmpi eq, %145, %188 : vector<8x128xi32>
    %c5_i32 = arith.constant 5 : i32
    %190 = vector.broadcast %c5_i32 : i32 to vector<8x128xi32>
    %191 = arith.cmpi eq, %146, %190 : vector<8x128xi32>
    %192 = arith.andi %189, %191 : vector<8x128xi1>
    %193 = vector.shape_cast %144 : vector<1x1xf32> to vector<1x1xf32>
    %194 = vector.broadcast %193 : vector<1x1xf32> to vector<8x128xf32>
    %195 = arith.select %192, %194, %187 : vector<8x128xi1>, vector<8x128xf32>
    %c0_53 = arith.constant 0 : index
    %c0_54 = arith.constant 0 : index
    %c0_55 = arith.constant 0 : index
    %196 = vector.load %arg7[%c0_53, %c0_54, %c0_55] : memref<1x8x128xf32, #tpu.memory_space<vmem>>, vector<1x8x128xf32>
    %197 = vector.shape_cast %196 : vector<1x8x128xf32> to vector<8x128xf32>
    %198 = vector.shape_cast %195 : vector<8x128xf32> to vector<1x8x128xf32>
    tpu.vector_store %arg7[%c0_53, %c0_54, %c0_55], %198 {strides = array<i32>} : memref<1x8x128xf32, #tpu.memory_space<vmem>>, vector<1x8x128xf32>,
    return
  }
  func.func @transform_0(%arg0: i32) -> (i32, i32) {
    %c0_i32 = arith.constant 0 : i32
    %c0_i32_0 = arith.constant 0 : i32
    return %arg0, %c0_i32 : i32, i32
  }
  func.func @transform_1(%arg0: i32) -> (i32, i32) {
    %c0_i32 = arith.constant 0 : i32
    %c0_i32_0 = arith.constant 0 : i32
    %c0_i32_1 = arith.constant 0 : i32
    return %c0_i32, %c0_i32_0 : i32, i32
  }
  func.func @transform_2(%arg0: i32) -> (i32, i32) {
    %c0_i32 = arith.constant 0 : i32
    %c0_i32_0 = arith.constant 0 : i32
    %c0_i32_1 = arith.constant 0 : i32
    return %c0_i32, %c0_i32_0 : i32, i32
  }
  func.func @transform_3(%arg0: i32) -> (i32, i32) {
    %c0_i32 = arith.constant 0 : i32
    %c0_i32_0 = arith.constant 0 : i32
    %c0_i32_1 = arith.constant 0 : i32
    return %c0_i32, %c0_i32_0 : i32, i32
  }
  func.func @transform_4(%arg0: i32) -> (i32, i32) {
    %c0_i32 = arith.constant 0 : i32
    %c0_i32_0 = arith.constant 0 : i32
    return %arg0, %c0_i32 : i32, i32
  }
  func.func @transform_5(%arg0: i32) -> (i32, i32) {
    %c0_i32 = arith.constant 0 : i32
    %c0_i32_0 = arith.constant 0 : i32
    return %arg0, %c0_i32 : i32, i32
  }
  func.func @transform_6(%arg0: i32) -> (i32, i32, i32) {
    %c0_i32 = arith.constant 0 : i32
    %c0_i32_0 = arith.constant 0 : i32
    %c0_i32_1 = arith.constant 0 : i32
    return %arg0, %c0_i32, %c0_i32_0 : i32, i32, i32
  }
}

</mosaic_0001>

<bundles_post_ra>
// kernel: tpu_custom_call.1
= control target key start
LH: loop header
LB: loop body
LE: loop exit
PB: predicated region body
PF: predicated region fallthrough
CT: control target
= control target key end

     0   :  { %12 = vsyncpa [#allocation3], 0  ;;  %s914_s0 = inlined_call_operand.hbm [shape: bf16[8,128], index: 0, kind: input, shape index: {}]   ;;  %s915_s1 = inlined_call_operand.hbm [shape: bf16[128,128], index: 1, kind: input, shape index: {}]   ;;  %s916_s2 = inlined_call_operand.hbm [shape: f32[8,128], index: 2, kind: input, shape index: {}]   ;;  %s917_s3 = inlined_call_operand.hbm [shape: bf16[128,128], index: 3, kind: input, shape index: {}]   ;;  %s918_s4 = inlined_call_operand.hbm [shape: f32[8,128], index: 4, kind: input, shape index: {}]   ;;  %s919_s5 = inlined_call_operand.hbm [shape: f32[8,128], index: 5, kind: output, shape index: {0}]   ;;  %s920_s6 = inlined_call_operand.hbm [shape: f32[1,8,128], index: 6, kind: output, shape index: {1}]  }
   0x1   :  { %13 = vsyncpa [#allocation6], 0 }
   0x2   :  { %14 = vsyncpa [#allocation9], 0 }
   0x3   :  { %15 = vsyncpa [#allocation4], 0  ;;  %s32_s23 = sshll.u32 %s915_s1, 4  ;;  %s33_s23 = int_to_ptr.hbm [resolvable:$true] %s32_s23 }
   0x4   :  { %16 = vsyncpa [#allocation13], 0  ;;  %s770_s24 = smov [#allocation5]   ;;  %s56_s28 = sshll.u32 %s917_s3, 4  ;;  %s57_s28 = int_to_ptr.hbm [resolvable:$true] %s56_s28 }
   0x5   :  { %s34_s25 = sshll.u32 %s770_s24, 4  ;;  %s771_s29 = smov 64   ;;  %s35_s25 = int_to_ptr.vmem [resolvable:$true] %s34_s25 }
   0x6   :  { %s772_s30 = smov 4   ;;  %s773_s7 = smov [#allocation8]  }
   0x7   :  { %40 = dma.hbm_to_vmem [thread:$0]  %s33_s23, 1024, %s35_s25, [#allocation6], %s771_s29, %s771_s29, %s772_s30  }
   0x8   :  { %s58_s8 = sshll.u32 %s773_s7, 4  ;;  %s22_s11 = sshll.u32 %s914_s0, 4  ;;  %s59_s8 = int_to_ptr.vmem [resolvable:$true] %s58_s8  ;;  %s23_s11 = int_to_ptr.hbm [resolvable:$true] %s22_s11 }
   0x9   :  { %64 = dma.hbm_to_vmem [thread:$0]  %s57_s28, 1024, %s59_s8, [#allocation9], %s771_s29, %s771_s29, %s772_s30  }
   0xa   :  { %s46_s13 = sshll.u32 %s916_s2, 4  ;;  %s774_s14 = smov [#allocation2]   ;;  %s47_s13 = int_to_ptr.hbm [resolvable:$true] %s46_s13 }
   0xb   :  { %s24_s15 = sshll.u32 %s774_s14, 4  ;;  %s775_s3 = smov [#allocation7]   ;;  %s25_s15 = int_to_ptr.vmem [resolvable:$true] %s24_s15 }
   0xc   :  { %27 = dma.hbm_to_vmem [thread:$0]  %s23_s11, 64, %s25_s15, [#allocation3]  }
   0xd   :  { %s48_s16 = sshll.u32 %s775_s3, 4  ;;  %s70_s19 = sshll.u32 %s918_s4, 4  ;;  %s49_s16 = int_to_ptr.vmem [resolvable:$true] %s48_s16  ;;  %s71_s19 = int_to_ptr.hbm [resolvable:$true] %s70_s19 }
   0xe   :  { %51 = dma.hbm_to_vmem [thread:$0]  %s47_s13, 128, %s49_s16, [#allocation6]  }
   0xf   :  { %s776_s0 = smov [#allocation10]  }
  0x10   :  { %s72_s20 = sshll.u32 %s776_s0, 4  ;;  %s73_s20 = int_to_ptr.vmem [resolvable:$true] %s72_s20 }
  0x11   :  { %75 = dma.hbm_to_vmem [thread:$0]  %s71_s19, 128, %s73_s20, [#allocation9]  }
  0x12   :  { %760 = dma.done.wait [#allocation3], 64  }
  0x13   :  { %761 = vsyncadd [#allocation3], 4294967232 }
  0x14   :  { %762 = dma.done.wait [#allocation6], 1152  }
  0x15   :  { %763 = vsyncadd [#allocation6], 4294966144 }
  0x16   :  { %764 = dma.done.wait [#allocation9], 1152  }
  0x17   :  { %765 = vsyncadd [#allocation9], 4294966144  ;;  %v549_v0 = vld [vmem:[#allocation5 + $0x38] sm:$0xff]  ;;  %v548_v1 = vld [vmem:[#allocation5 + $0x30] sm:$0xff]  ;;  %v777_v18 = vmov 1   ;;  %v778_v21 = vmov 2   ;;  %v259_v29 = vlaneseq }
  0x18   :  { %164 = vmatpush.bf16.msra.mxu0 %v549_v0  ;;  %v557_v2 = vld [vmem:[#allocation8 + $0x38] sm:$0xff]  ;;  %v556_v3 = vld [vmem:[#allocation8 + $0x30] sm:$0xff]  ;;  %v547_v4 = vld [vmem:[#allocation5 + $0x28] sm:$0xff]  ;;  %574 = vset.pattern.permute.xlu2 %v777_v18  ;;  %v779_v28 = vmov 0   ;;  %v780_v60 = vmov 4   ;;  %vm342_vm10 = vcmask 31768  }
  0x19   :  { %244 = vmatpush.bf16.msra.mxu1 %v557_v2  ;;  %v555_v5 = vld [vmem:[#allocation8 + $0x28] sm:$0xff]  ;;  %v546_v6 = vld [vmem:[#allocation5 + $0x20] sm:$0xff]  ;;  %v554_v7 = vld [vmem:[#allocation8 + $0x20] sm:$0xff]  ;;  %573 = vset.pattern.permute.xlu1 %v779_v28  ;;  %v840_v30 = vand.u32 127, %v259_v29  ;;  %v781_v0 = vmov 3   ;;  %vm376_vm11 = vcmask 48168  }
  0x1a   :  { %v545_v8 = vld [vmem:[#allocation5 + $0x18] sm:$0xff]  ;;  %v553_v9 = vld [vmem:[#allocation8 + $0x18] sm:$0xff]  ;;  %v544_v10 = vld [vmem:[#allocation5 + $0x10] sm:$0xff]  ;;  %577 = vset.pattern.permute.xlu0 %v781_v0  ;;  %vm359_vm12 = vcmask 39968   ;;  %s782_s2 = smov [#allocation11]   ;;  %s450_s23 = sshll.u32 %s919_s5, 4  ;;  %s451_s23 = int_to_ptr.hbm [resolvable:$true] %s450_s23 }
  0x1b   :  { %v552_v11 = vld [vmem:[#allocation8 + $0x10] sm:$0xff]  ;;  %v543_v12 = vld [vmem:[#allocation5 + $0x8] sm:$0xff]  ;;  %v542_v13 = vld [vmem:[#allocation5] sm:$0xff]  ;;  %vm266_vm0 = vcmp.ge.s32.totalorder %v840_v30, 8  ;;  %vm267_vm1 = vcmp.lt.s32.totalorder %v840_v30, 10  ;;  %vm262_vm3 = vcmp.lt.s32.totalorder %v840_v30, 3  ;;  %v261_v40 = vcvt.s32.f32 %v840_v30 }
  0x1c   :  { %165 = vmatpush.bf16.msra.mxu0 %v548_v1  ;;  %v96_v14 = vld [vmem:[#allocation2] sm:$0xf]  ;;  %v551_v15 = vld [vmem:[#allocation8 + $0x8] sm:$0xff]  ;;  %v550_v16 = vld [vmem:[#allocation8] sm:$0xff]  ;;  %vm263_vm4 = vcmp.ge.s32.totalorder %v840_v30, 3  ;;  %vm264_vm5 = vcmp.lt.s32.totalorder %v840_v30, 8 }
  0x1d   :  { %245 = vmatpush.bf16.msra.mxu1 %v556_v3  ;;  %v835_v17 = vld [vmem:[#allocation10] sm:$0xff]  ;;  %v582_v22 = vld [vmem:[#allocation7] ss:$0 sm:$0xff]  ;;  %v583_v31 = vld [vmem:[#allocation7 + $0x1] ss:$0 sm:$0xff]  ;;  %s448_s4 = sshll.u32 %s782_s2, 4  ;;  %s449_s4 = int_to_ptr.vmem [resolvable:$true] %s448_s4 }
  0x1e   :  { %v320_v19 = vadd.f32 3.0, %v835_v17  ;;  %v330_v20 = vadd.f32 8.0, %v835_v17  ;;  %vm846_vm2 = vmand %vm266_vm0, %vm267_vm1  ;;  %v350_v63 = vsel %vm342_vm10, %v835_v17, 0.0  ;;  %vm394_vm14 = vcmp.eq.s32.totalorder %v840_v30, 0  ;;  %s784_s5 = smov [#allocation12]   ;;  %s461_s27 = sshll.u32 %s920_s6, 4  ;;  %s462_s27 = int_to_ptr.hbm [resolvable:$true] %s461_s27 }
  0x1f   :  { %vm857_vm6 = vmand %vm263_vm4, %vm264_vm5  ;;  %v351_v1 = vrot.slane %v350_v63, 4  ;;  %vm402_vm15 = vcmp.eq.s32.totalorder %v840_v30, 1  ;;  %vm418_vm4 = vcmp.eq.s32.totalorder %v840_v30, 3  ;;  %vm426_vm5 = vcmp.eq.s32.totalorder %v840_v30, 4  ;;  %s459_s24 = sshll.u32 %s784_s5, 4  ;;  %s460_s24 = int_to_ptr.vmem [resolvable:$true] %s459_s24 }
  0x20   :  { %166 = vmatpush.bf16.msra.mxu0 %v547_v4  ;;  %323 = vperm.xlu2 %574, %v320_v19  }
  0x21   :  { %246 = vmatpush.bf16.msra.mxu1 %v555_v5  ;;  %v352_v3 = vadd.f32 %v351_v1, %v350_v63  ;;  %v392_v1 = vshrl.u32 %v259_v29, 7 }
  0x23   :  { %vm393_vm13 = vcmp.eq.s32.totalorder %v392_v1, 0 }
  0x24   :  { %167 = vmatpush.bf16.msra.mxu0 %v546_v6  ;;  %vm395_vm0 = vmand %vm393_vm13, %vm394_vm14 }
  0x25   :  { %247 = vmatpush.bf16.msra.mxu1 %v554_v7 }
  0x28   :  { %168 = vmatpush.bf16.msra.mxu0 %v545_v8  ;;  %575 = vset.pattern.permute.xlu2 %v778_v21  ;;  %v384_v8 = vsel %vm376_vm11, %v835_v17, 0.0 }
  0x29   :  { %248 = vmatpush.bf16.msra.mxu1 %v553_v9  ;;  %333 = vperm.xlu2 %575, %v330_v20  }
  0x2c   :  { %169 = vmatpush.bf16.msra.mxu0 %v544_v10 }
  0x2d   :  { %249 = vmatpush.bf16.msra.mxu1 %v552_v11  ;;  %v353_v11 = vrot.slane %v352_v3, 2 }
  0x30   :  { %170 = vmatpush.bf16.msra.mxu0 %v543_v12  ;;  %v367_v12 = vsel %vm359_vm12, %v835_v17, 0.0 }
  0x31   :  { %250 = vmatpush.bf16.msra.mxu1 %v551_v15  ;;  %576 = vset.pattern.permute.xlu2 %v781_v0  ;;  %v385_v15 = vrot.slane %v384_v8, 4 }
  0x34   :  { %171 = vmatpush.bf16.msra.mxu0 %v542_v13 }
  0x35   :  { %251 = vmatpush.bf16.msra.mxu1 %v550_v16  ;;  %v354_v16 = vadd.f32 %v353_v11, %v352_v3 }
  0x37   :  { %172 = vmatmul.bf16.vlgmr.msra.gmra.mxu0 %v96_v14  ;;  %v368_v14 = vrot.slane %v367_v12, 4  ;;  %v355_v21 = vrot.slane %v354_v16, 1 }
  0x39   :  { %v369_v19 = vadd.f32 %v368_v14, %v367_v12 }
  0x7a   :  { %v324_v41 = vpop.permute.xlu2 %323 }
  0x7b   :  { %vm326_vm7 = vcmp.eq.f32.partialorder %v261_v40, %v324_v41 }
  0x83   :  { %v334_v58 = vpop.permute.xlu2 %333 }
  0x84   :  { %vm336_vm9 = vcmp.eq.f32.partialorder %v261_v40, %v334_v58 }
  0xb4   :  { %v173_v23 = vpop.f32.mrf.mxu0 }
  0xb5   :  { %v174_v24 = vadd.f32 %v582_v22, %v173_v23 }
  0xb7   :  { %v177_v25 = vmax.f32 %v174_v24, 0.0 }
  0xb9   :  { %v178_v26 = vpack.c.bf16 %v177_v25, %v177_v25  ;;  %v370_v25 = vrot.slane %v369_v19, 2 }
  0xbb   :  { %252 = vmatmul.bf16.vlgmr.msra.gmra.mxu1 %v178_v26 }
  0xbc   :  { %v175_v27 = vpop.f32.mrf.mxu0 }
  0xbd   :  { %v386_v27 = vadd.f32 %v385_v15, %v384_v8 }
 0x138   :  { %v253_v32 = vpop.f32.mrf.mxu1 }
 0x139   :  { %v254_v34 = vadd.f32 %v583_v31, %v253_v32  ;;  %v356_v31 = vadd.f32 %v355_v21, %v354_v16  ;;  %v371_v32 = vadd.f32 %v370_v25, %v369_v19 }
 0x13b   :  { %257 = vst [vmem:[#allocation11] sm:$0xff] %v254_v34  ;;  %v281_v35 = vsel %vm846_vm2, %v254_v34, -1e+30  ;;  %v271_v36 = vsel %vm262_vm3, %v254_v34, -1e+30  ;;  %v327_v42 = vsel %vm326_vm7, %v254_v34, 0.0  ;;  %vm419_vm7 = vmand %vm393_vm13, %vm418_vm4 }
 0x13c   :  { %282 = vmax.xlane.f32.xlu0 %v281_v35  ;;  %272 = vmax.xlane.f32.xlu1 %v271_v36  ;;  %v276_v39 = vsel %vm857_vm6, %v254_v34, -1e+30  ;;  %v337_v59 = vsel %vm336_vm9, %v254_v34, 0.0  ;;  %v372_v36 = vrot.slane %v371_v32, 1  ;;  %453 = dma.vmem_to_hbm [thread:$0]  %s449_s4, 128, %s451_s23, [#allocation4]  }
 0x140   :  { %v255_v37 = vpop.f32.mrf.mxu1 }
 0x144   :  { %277 = vmax.xlane.f32.xlu0 %v276_v39  ;;  %v387_v39 = vrot.slane %v386_v27, 2 }
 0x155   :  { %313 = vperm.xlu1 %573, %v835_v17  }
 0x15d   :  { %578 = vset.pattern.permute.xlu1 %v780_v60 }
 0x17f   :  { %328 = vadd.xlane.f32.xlu1 %v327_v42 }
 0x1af   :  { %v865_v43 = vpop.xlane.xlu0 %282  ;;  %v273_v46 = vpop.xlane.xlu1 %272 }
 0x1b0   :  { %v284_v44 = vsel %vm846_vm2, %v865_v43, 0.0 }
 0x1b7   :  { %v278_v45 = vpop.xlane.xlu0 %277 }
 0x1b8   :  { %v285_v47 = vsel %vm857_vm6, %v278_v45, %v284_v44 }
 0x1b9   :  { %v286_v48 = vsel %vm262_vm3, %v273_v46, %v285_v47 }
 0x1ba   :  { %v287_v49 = vsub.f32 %v254_v34, %v286_v48 }
 0x1bc   :  { %v288_v50 = vmul.f32 1.442695, %v287_v49  ;;  %v388_v49 = vadd.f32 %v387_v39, %v386_v27 }
 0x1be   :  { %584 = vpow2.f32 %v288_v50 }
 0x1c4   :  { %v585_v51 = vpop.eup %584 }
 0x1c5   :  { %v292_v52 = vsel %vm267_vm1, %v585_v51, 0.0  ;;  %vm403_vm1 = vmand %vm393_vm13, %vm402_vm15 }
 0x1c6   :  { %v299_v53 = vsel %vm857_vm6, %v292_v52, 0.0  ;;  %v293_v54 = vsel %vm262_vm3, %v292_v52, 0.0  ;;  %v305_v55 = vsel %vm846_vm2, %v292_v52, 0.0  ;;  %vm410_vm2 = vcmp.eq.s32.totalorder %v840_v30, 2 }
 0x1c7   :  { %300 = vadd.xlane.f32.xlu2 %v299_v53  ;;  %294 = vadd.xlane.f32.xlu0 %v293_v54  ;;  %v314_v56 = vpop.permute.xlu1 %313  ;;  %vm411_vm3 = vmand %vm393_vm13, %vm410_vm2  ;;  %vm434_vm6 = vcmp.eq.s32.totalorder %v840_v30, 5 }
 0x1c8   :  { %vm316_vm8 = vcmp.eq.f32.partialorder %v261_v40, %v314_v56  ;;  %vm435_vm9 = vmand %vm393_vm13, %vm434_vm6 }
 0x1c9   :  { %v317_v57 = vsel %vm316_vm8, %v254_v34, 0.0  ;;  %vm427_vm8 = vmand %vm393_vm13, %vm426_vm5 }
 0x1cf   :  { %306 = vadd.xlane.f32.xlu0 %v305_v55  ;;  %v389_v55 = vrot.slane %v388_v49, 1 }
 0x1d7   :  { %318 = vadd.xlane.f32.xlu0 %v317_v57 }
 0x1df   :  { %338 = vadd.xlane.f32.xlu0 %v337_v59  ;;  %406 = vperm.xlu2 %576, %v356_v31  }
 0x1e7   :  { %579 = vset.pattern.permute.xlu2 %v780_v60 }
 0x1f2   :  { %v329_v9 = vpop.xlane.xlu1 %328 }
 0x23a   :  { %v301_v61 = vpop.xlane.xlu2 %300  ;;  %v295_v62 = vpop.xlane.xlu0 %294 }
 0x23b   :  { %586 = vlog2.f32 %v301_v61  ;;  %v783_v61 = vmov 5  }
 0x23c   :  { %588 = vlog2.f32 %v295_v62 }
 0x241   :  { %v587_v2 = vpop.eup %586 }
 0x242   :  { %v589_v4 = vpop.eup %588  ;;  %v303_v5 = vmul.f32 0.6931472, %v587_v2  ;;  %v307_v6 = vpop.xlane.xlu0 %306 }
 0x243   :  { %590 = vlog2.f32 %v307_v6  ;;  %v297_v10 = vmul.f32 0.6931472, %v589_v4  ;;  %v407_v0 = vpop.permute.xlu2 %406 }
 0x244   :  { %v304_v7 = vadd.f32 %v303_v5, %v278_v45 }
 0x245   :  { %v298_v20 = vadd.f32 %v297_v10, %v273_v46  ;;  %v373_v46 = vadd.f32 %v372_v36, %v371_v32 }
 0x246   :  { %v357_v13 = vsub.f32 %v304_v7, %v329_v9 }
 0x247   :  { %422 = vperm.xlu2 %579, %v373_v46  }
 0x248   :  { %v358_v18 = vmul.f32 %v357_v13, %v835_v17 }
 0x249   :  { %v591_v22 = vpop.eup %590 }
 0x24a   :  { %v319_v23 = vpop.xlane.xlu0 %318  ;;  %v360_v24 = vsel %vm359_vm12, %v358_v18, 0.0  ;;  %v309_v33 = vmul.f32 0.6931472, %v591_v22 }
 0x24b   :  { %v340_v26 = vsub.f32 %v298_v20, %v319_v23  ;;  %v361_v28 = vrot.slane %v360_v24, 4 }
 0x24c   :  { %v310_v41 = vadd.f32 %v309_v33, %v865_v43 }
 0x24d   :  { %v341_v34 = vmul.f32 %v340_v26, %v835_v17  ;;  %v362_v35 = vadd.f32 %v361_v28, %v360_v24 }
 0x24f   :  { %v343_v37 = vsel %vm342_vm10, %v341_v34, 0.0  ;;  %v363_v38 = vrot.slane %v362_v35, 2  ;;  %581 = vset.pattern.permute.xlu2 %v783_v61 }
 0x250   :  { %v344_v40 = vrot.slane %v343_v37, 4 }
 0x251   :  { %v364_v42 = vadd.f32 %v363_v38, %v362_v35 }
 0x252   :  { %v345_v44 = vadd.f32 %v344_v40, %v343_v37  ;;  %v339_v45 = vpop.xlane.xlu0 %338 }
 0x253   :  { %v374_v47 = vsub.f32 %v310_v41, %v339_v45  ;;  %v365_v48 = vrot.slane %v364_v42, 1 }
 0x254   :  { %v346_v50 = vrot.slane %v345_v44, 2 }
 0x255   :  { %v375_v51 = vmul.f32 %v374_v47, %v835_v17  ;;  %v366_v52 = vadd.f32 %v365_v48, %v364_v42  ;;  %v390_v17 = vadd.f32 %v389_v55, %v388_v49 }
 0x256   :  { %v347_v53 = vadd.f32 %v346_v50, %v345_v44 }
 0x257   :  { %v377_v54 = vsel %vm376_vm11, %v375_v51, 0.0  ;;  %414 = vperm.xlu1 %578, %v366_v52   ;;  %438 = vperm.xlu2 %581, %v390_v17  }
 0x258   :  { %v378_v43 = vrot.slane %v377_v54, 4  ;;  %v348_v56 = vrot.slane %v347_v53, 1 }
 0x25a   :  { %v379_v57 = vadd.f32 %v378_v43, %v377_v54  ;;  %v349_v58 = vadd.f32 %v348_v56, %v347_v53 }
 0x25c   :  { %v380_v59 = vrot.slane %v379_v57, 2  ;;  %398 = vperm.xlu0 %577, %v349_v58  }
 0x25e   :  { %v381_v60 = vadd.f32 %v380_v59, %v379_v57 }
 0x260   :  { %v382_v62 = vrot.slane %v381_v60, 1 }
 0x262   :  { %v383_v63 = vadd.f32 %v382_v62, %v381_v60 }
 0x264   :  { %580 = vset.pattern.permute.xlu0 %v783_v61 }
 0x265   :  { %430 = vperm.xlu0 %580, %v383_v63  }
 0x2a1   :  { %v423_v2 = vpop.permute.xlu2 %422 }
 0x2b1   :  { %v439_v7 = vpop.permute.xlu2 %438 }
 0x2c9   :  { %v415_v29 = vpop.permute.xlu1 %414 }
 0x2ce   :  { %v399_v3 = vpop.permute.xlu0 %398 }
 0x2cf   :  { %v401_v4 = vsel %vm395_vm0, %v399_v3, 0.0 }
 0x2d0   :  { %v409_v5 = vsel %vm403_vm1, %v407_v0, %v401_v4 }
 0x2d1   :  { %v417_v6 = vsel %vm411_vm3, %v415_v29, %v409_v5 }
 0x2d2   :  { %v425_v8 = vsel %vm419_vm7, %v423_v2, %v417_v6 }
 0x2d7   :  { %v431_v9 = vpop.permute.xlu0 %430 }
 0x2d8   :  { %v433_v10 = vsel %vm427_vm8, %v431_v9, %v425_v8 }
 0x2d9   :  { %v441_v30 = vsel %vm435_vm9, %v439_v7, %v433_v10 }
 0x2da   :  { %442 = vst [vmem:[#allocation12] sm:$0xff] %v441_v30 }
 0x2db   :  { %464 = dma.vmem_to_hbm [thread:$0]  %s460_s24, 128, %s462_s27, [#allocation13]  }
 0x2dc   :  { %766 = dma.done.wait [#allocation4], 128  }
 0x2dd   :  { %767 = vsyncadd [#allocation4], 4294967168 }
 0x2de   :  { %768 = dma.done.wait [#allocation13], 128  }
 0x2df   :  { %769 = vsyncadd [#allocation13], 4294967168 }
 0x2e0   :  { %473 = vsyncpa [#allocation3], 1 }
 0x2e1   :  { %474 = vsyncpa [#allocation6], 1 }
 0x2e2   :  { %475 = vsyncpa [#allocation9], 1 }
 0x2e3   :  { %476 = vsyncpa [#allocation4], 1 }
 0x2e4   :  { %477 = vsyncpa [#allocation13], 1 }

</bundles_post_ra>
